<compile_context>
chip_gen: v5e
topology: v5e:2x2
jax: 0.10.0
libtpu: 0.0.40
codegen_flags: <defaults>
</compile_context>

<pallas_src>
import functools

import jax
import jax.numpy as jnp
from jax.experimental import pallas as pl
from jax.experimental.pallas import tpu as pltpu


def _int_pow(x, n):
    """x**n for static integer n >= 1 via exponentiation-by-squaring (VPU only)."""
    acc = None
    base = x
    while n > 0:
        if n & 1:
            acc = base if acc is None else acc * base
        n >>= 1
        if n:
            base = base * base
    return acc


def _choose_tiles(N, C, HW, itemsize):
    """Pick (NB, TC, THW) block sizes for x viewed as (N, C, HW)."""
    try:
        vmem_cap = int(pltpu.get_tpu_info().vmem_capacity_bytes)
    except Exception:  # pragma: no cover - conservative fallback
        vmem_cap = 128 * 1024 * 1024
    # Per-block budget (input is double-buffered by the pipeline):
    # ~6 MiB on v7x (64 MiB VMEM), ~12 MiB on v5e/v6e (128 MiB).
    budget = (6 if vmem_cap <= 64 * 1024 * 1024 else 12) * 1024 * 1024

    # dtype-native sublane granule for the C (sublane) axis: 8 f32 / 16 bf16 / 32 int8.
    sub = max(8, 32 // itemsize)
    min_tc = C if C < sub else sub

    # Spatial (lane) tile: full HW when a minimal block fits (typical: HW<=~10^5),
    # otherwise chunks that are multiples of 128 (partial last block masked in-kernel).
    if min_tc * HW * itemsize <= budget:
        thw = HW
    else:
        thw = min(HW, max(128, (budget // (min_tc * itemsize)) // 128 * 128))

    # Channel (sublane) tile.
    if C * thw * itemsize <= budget or C <= sub:
        tc = C
    else:
        tc = max(sub, (budget // (thw * itemsize)) // sub * sub)

    # Keep >=2 blocks on a *parallel* grid axis (v7x has 2 TensorCores): if the
    # batch axis can't provide them, split channels when cleanly divisible.
    if N == 1 and tc == C and C % (2 * sub) == 0:
        tc = C // 2

    grid_c = pl.cdiv(C, tc)

    # Fold batches into one block to amortize per-step overhead, but never
    # collapse the parallel axes to a single block when N >= 2.
    nb = 1
    for d in sorted((d for d in range(1, N + 1) if N % d == 0), reverse=True):
        if d * tc * thw * itemsize > budget:
            continue
        if N >= 2 and grid_c == 1 and (N // d) < 2:
            continue
        nb = d
        break
    return nb, tc, thw


def _gem_kernel(p_ref, x_ref, o_ref, acc_ref, *, eps, hw_true, thw, static_p):
    # p_ref:   SMEM (1,) f32        -- learnable GeM exponent (unused if static_p)
    # x_ref:   VMEM (NB, TC, THW)   -- HW on lanes, C on sublanes
    # o_ref:   VMEM (NB, TC, 1)
    # acc_ref: VMEM (NB, TC, 1) f32 -- persists across the spatial grid axis
    k = pl.program_id(2)

    @pl.when(k == 0)
    def _init():
        acc_ref[...] = jnp.zeros_like(acc_ref)

    # Upcast immediately: the kernel is HBM-bound, so f32 elementwise math is
    # wall-clock free and sidesteps bf16 EUP/VALU issues (v5e) + accuracy loss.
    x = x_ref[...].astype(jnp.float32)
    xc = jnp.maximum(x, jnp.float32(eps))                 # clamp(min=eps) > 0

    if static_p is not None:
        xp = _int_pow(xc, static_p)                        # pure VPU multiplies
    else:
        xp = jnp.exp(p_ref[0] * jnp.log(xc))               # f32 EUP path

    # Only the last spatial block can be partial (grid extent = cdiv(HW, THW));
    # mask its out-of-range lanes before accumulating.  Select does not
    # propagate NaN/Inf from the garbage tail into valid rows.
    if hw_true % thw != 0:
        col = k * thw + jax.lax.broadcasted_iota(jnp.int32, xp.shape, 2)
        xp = jnp.where(col < hw_true, xp, 0.0)

    # Partial spatial sum (lane reduce), accumulated in f32.
    acc_ref[...] += jnp.sum(xp, axis=-1, keepdims=True)

    @pl.when(k == pl.num_programs(2) - 1)
    def _finalize():
        m = acc_ref[...] * jnp.float32(1.0 / hw_true)      # exact mean over true H*W
        if static_p is not None:
            inv_p = jnp.float32(1.0 / static_p)
        else:
            inv_p = 1.0 / p_ref[0]                         # scalar-unit divide
        o_ref[...] = jnp.exp(jnp.log(m) * inv_p).astype(o_ref.dtype)  # m**(1/p)


def gem_pooling(x, p=3.0, eps=1e-6):
    """GeM pooling. x: (N, C, H, W) -> (N, C, 1, 1)."""
    N, C, H, W = x.shape
    HW = H * W
    itemsize = x.dtype.itemsize

    # Zero-copy view: HW is already contiguous in NCHW, no transpose / pad pass.
    xr = x.reshape(N, C, HW)

    NB, TC, THW = _choose_tiles(N, C, HW, itemsize)
    grid = (pl.cdiv(N, NB), pl.cdiv(C, TC), pl.cdiv(HW, THW))

    # Specialize a static integer p (the module default p=3) to the VPU-only path.
    static_p = None
    if isinstance(p, (int, float)) and float(p) == int(p) and int(p) >= 1:
        static_p = int(p)
    p_arr = jnp.asarray(p, jnp.float32).reshape(1)         # trainable exponent

    block_bytes = NB * TC * THW * itemsize
    vmem_limit = int(min(
        128 * 1024 * 1024,
        max(8 * 1024 * 1024,
            2 * block_bytes + 2 * NB * TC * itemsize + NB * TC * 4 + (2 << 20))))

    cost = pl.CostEstimate(
        flops=int((static_p if static_p is not None else 3) * N * C * HW + 2 * N * C),
        transcendentals=0 if static_p is not None else int(2 * N * C * HW),
        bytes_accessed=int(N * C * HW * itemsize + N * C * itemsize),
    )

    kernel = functools.partial(
        _gem_kernel, eps=eps, hw_true=HW, thw=THW, static_p=static_p)

    out = pl.pallas_call(
        kernel,
        out_shape=jax.ShapeDtypeStruct((N, C, 1), x.dtype),
        grid=grid,
        in_specs=[
            pl.BlockSpec(memory_space=pltpu.MemorySpace.SMEM),       # p scalar
            pl.BlockSpec((NB, TC, THW), lambda b, c, k: (b, c, k)),  # x tile
        ],
        out_specs=pl.BlockSpec((NB, TC, 1), lambda b, c, k: (b, c, 0)),
        scratch_shapes=[pltpu.VMEM((NB, TC, 1), jnp.float32)],
        compiler_params=pltpu.CompilerParams(
            dimension_semantics=("parallel", "parallel", "arbitrary"),
            vmem_limit_bytes=vmem_limit,
        ),
        cost_estimate=cost,
    )(p_arr, xr)

    return out.reshape(N, C, 1, 1)


def _gem_reference(x, p, eps):
    xc = jnp.maximum(x.astype(jnp.float32), eps) ** p
    return jnp.mean(xc, axis=(-2, -1), keepdims=True) ** (1.0 / p)


if __name__ == "__main__":
    key = jax.random.PRNGKey(0)
    p = 3.0          # nn.Parameter(torch.ones(1) * 3.0) initialized deterministically
    eps = 1e-6

    # Small NCHW input consistent with the module's forward.
    x = jax.random.normal(key, (2, 4, 16, 16), dtype=jnp.float32)

    # Static-p (inference) path.
    out = jax.block_until_ready(gem_pooling(x, p=p, eps=eps))
    ref = _gem_reference(x, p, eps)
    assert out.shape == (2, 4, 1, 1), out.shape
    assert jnp.allclose(out, ref, rtol=1e-5, atol=1e-5), (
        f"max abs err {jnp.max(jnp.abs(out - ref))}")

    # Runtime-p (trainable parameter) path.
    p_arr = jnp.asarray([3.0], jnp.float32)
    out2 = jax.block_until_ready(gem_pooling(x, p=p_arr, eps=eps))
    assert jnp.allclose(out2, ref, rtol=1e-4, atol=1e-5), (
        f"max abs err {jnp.max(jnp.abs(out2 - ref))}")

    # ResNet-GeM-like spatial size (HW=49, exercises the non-multiple-of-128
    # full-extent lane block).
    x2 = jax.random.normal(jax.random.PRNGKey(1), (2, 8, 7, 7), dtype=jnp.float32)
    out3 = jax.block_until_ready(gem_pooling(x2, p=p, eps=eps))
    ref3 = _gem_reference(x2, p, eps)
    assert jnp.allclose(out3, ref3, rtol=1e-5, atol=1e-5), (
        f"max abs err {jnp.max(jnp.abs(out3 - ref3))}")

    print("KERNEL_OK")
</pallas_src>

<mosaic_0001>
module attributes {stable_mosaic.version = 11 : i64} {
  func.func @_gem_kernel(%arg0: i32, %arg1: i32, %arg2: i32, %arg3: memref<1xf32, #tpu.memory_space<smem>>, %arg4: memref<1x4x256xf32, #tpu.memory_space<vmem>>, %arg5: memref<1x4x1xf32, #tpu.memory_space<vmem>>, %arg6: memref<1x4x1xf32, #tpu.memory_space<vmem>>) attributes {dimension_semantics = [#tpu.dimension_semantics<parallel>, #tpu.dimension_semantics<parallel>, #tpu.dimension_semantics<arbitrary>], iteration_bounds = array<i64: 2, 1, 1>, scalar_prefetch = 0 : i64, scratch_operands = 1 : i64, tpu.core_type = #tpu.core_type<tc>, window_params = [{transform_indices = @transform_0, window_bounds = array<i64: 1>}, {transform_indices = @transform_1, window_bounds = array<i64: 1, 4, 256>}, {transform_indices = @transform_2, window_bounds = array<i64: 1, 4, 1>}]} {
    %c0_i32 = arith.constant 0 : i32
    %0 = arith.cmpi eq, %arg2, %c0_i32 : i32
    %1 = arith.extui %0 : i1 to i32
    %c0_i32_0 = arith.constant 0 : i32
    %2 = arith.cmpi ne, %1, %c0_i32_0 : i32
    scf.if %2 {
      %cst_12 = arith.constant 0.000000e+00 : f32
      %16 = vector.broadcast %cst_12 : f32 to vector<1x4x1xf32>
      %c0_13 = arith.constant 0 : index
      %c0_14 = arith.constant 0 : index
      %c0_15 = arith.constant 0 : index
      %17 = vector.load %arg6[%c0_13, %c0_14, %c0_15] : memref<1x4x1xf32, #tpu.memory_space<vmem>>, vector<1x4x1xf32>
      tpu.vector_store %arg6[%c0_13, %c0_14, %c0_15], %16 {strides = array<i32>} : memref<1x4x1xf32, #tpu.memory_space<vmem>>, vector<1x4x1xf32>,
    } else {
    }
    %c0 = arith.constant 0 : index
    %c0_1 = arith.constant 0 : index
    %c0_2 = arith.constant 0 : index
    %3 = vector.load %arg4[%c0, %c0_1, %c0_2] : memref<1x4x256xf32, #tpu.memory_space<vmem>>, vector<1x4x256xf32>
    %cst = arith.constant 9.99999997E-7 : f32
    %4 = vector.broadcast %cst : f32 to vector<1x4x256xf32>
    %5 = arith.maximumf %3, %4 : vector<1x4x256xf32>
    %6 = arith.mulf %5, %5 : vector<1x4x256xf32>
    %7 = arith.mulf %5, %6 : vector<1x4x256xf32>
    %c0_3 = arith.constant 0 : index
    %c0_4 = arith.constant 0 : index
    %c0_5 = arith.constant 0 : index
    %8 = vector.load %arg6[%c0_3, %c0_4, %c0_5] : memref<1x4x1xf32, #tpu.memory_space<vmem>>, vector<1x4x1xf32>
    %cst_6 = arith.constant dense<0.000000e+00> : vector<1x4xf32>
    %9 = vector.multi_reduction <add>, %7, %cst_6 [2] : vector<1x4x256xf32> to vector<1x4xf32>
    %10 = vector.shape_cast %9 : vector<1x4xf32> to vector<1x4x1xf32>
    %11 = arith.addf %8, %10 : vector<1x4x1xf32>
    %c0_7 = arith.constant 0 : index
    %c0_8 = arith.constant 0 : index
    %c0_9 = arith.constant 0 : index
    %12 = vector.load %arg6[%c0_7, %c0_8, %c0_9] : memref<1x4x1xf32, #tpu.memory_space<vmem>>, vector<1x4x1xf32>
    tpu.vector_store %arg6[%c0_7, %c0_8, %c0_9], %11 {strides = array<i32>} : memref<1x4x1xf32, #tpu.memory_space<vmem>>, vector<1x4x1xf32>,
    %c0_i32_10 = arith.constant 0 : i32
    %13 = arith.cmpi eq, %arg2, %c0_i32_10 : i32
    %14 = arith.extui %13 : i1 to i32
    %c0_i32_11 = arith.constant 0 : i32
    %15 = arith.cmpi ne, %14, %c0_i32_11 : i32
    scf.if %15 {
      %c0_12 = arith.constant 0 : index
      %c0_13 = arith.constant 0 : index
      %c0_14 = arith.constant 0 : index
      %16 = vector.load %arg6[%c0_12, %c0_13, %c0_14] : memref<1x4x1xf32, #tpu.memory_space<vmem>>, vector<1x4x1xf32>
      %cst_15 = arith.constant 3.906250e-03 : f32
      %17 = vector.broadcast %cst_15 : f32 to vector<1x4x1xf32>
      %18 = arith.mulf %16, %17 : vector<1x4x1xf32>
      %19 = math.log %18 : vector<1x4x1xf32>
      %cst_16 = arith.constant 0.333333343 : f32
      %20 = vector.broadcast %cst_16 : f32 to vector<1x4x1xf32>
      %21 = arith.mulf %19, %20 : vector<1x4x1xf32>
      %22 = math.exp %21 : vector<1x4x1xf32>
      %c0_17 = arith.constant 0 : index
      %c0_18 = arith.constant 0 : index
      %c0_19 = arith.constant 0 : index
      %23 = vector.load %arg5[%c0_17, %c0_18, %c0_19] : memref<1x4x1xf32, #tpu.memory_space<vmem>>, vector<1x4x1xf32>
      tpu.vector_store %arg5[%c0_17, %c0_18, %c0_19], %22 {strides = array<i32>} : memref<1x4x1xf32, #tpu.memory_space<vmem>>, vector<1x4x1xf32>,
    } else {
    }
    return
  }
  func.func @transform_0(%arg0: i32, %arg1: i32, %arg2: i32) -> i32 {
    %c0_i32 = arith.constant 0 : i32
    %c0_i32_0 = arith.constant 0 : i32
    return %c0_i32 : i32
  }
  func.func @transform_1(%arg0: i32, %arg1: i32, %arg2: i32) -> (i32, i32, i32) {
    %c0_i32 = arith.constant 0 : i32
    return %arg0, %arg1, %arg2 : i32, i32, i32
  }
  func.func @transform_2(%arg0: i32, %arg1: i32, %arg2: i32) -> (i32, i32, i32) {
    %c0_i32 = arith.constant 0 : i32
    %c0_i32_0 = arith.constant 0 : i32
    return %arg0, %arg1, %c0_i32 : i32, i32, i32
  }
}

</mosaic_0001>

<bundles_post_ra>
// kernel: tpu_custom_call.1
= control target key start
LH: loop header
LB: loop body
LE: loop exit
PB: predicated region body
PF: predicated region fallthrough
CT: control target
= control target key end

     0   :  { %8 = vsyncpa [#allocation5], 0  ;;  %s589_s0 = inlined_call_operand.<no memory space> [shape: f32[1], index: 0, kind: input, shape index: {}]   ;;  %s590_s1 = inlined_call_operand.hbm [shape: f32[2,4,256], index: 1, kind: input, shape index: {}]   ;;  %s591_s2 = inlined_call_operand.vmem [shape: f32[2,4,1], index: 2, kind: output, shape index: {}]  }
   0x1   :  { %10 = vsyncpa [#allocation5 + $0x1], 0  ;;  %s498_s9 = smov 0   ;;  %s500_s10 = smov 0  }
   0x2   :  { %s502_s11 = smov 0   ;;  %s504_s12 = smov 0  }
   0x3   :  { %s506_s13 = smov 0   ;;  %s508_s14 = smov 0  }
   0x4 LB: > { %s327_s0 = sadd.s32 4294967295, %s480_s14   ;;  %s35_s15 = sadd.s32 1, %s476_s13  ;;  %s480_s14 = sphi %s508_s14, %s16_s14   ;;  %s476_s13 = sphi %s506_s13, %s598_s13   ;;  %s472_s12 = sphi %s504_s12, %s597_s12   ;;  %s468_s11 = sphi %s502_s11, %s596_s11   ;;  %s464_s10 = sphi %s500_s10, %s595_s10   ;;  %s460_s9 = sphi %s498_s9, %s594_s9  }
   0x5   : > { %p37_p0 = scmp.ge.s32.totalorder %s35_s15, 2  ;;  %s67_s16 = sadd.s32 1, %s468_s11 }
   0x6   : > { %p74_p1 = scmp.ne.s32.totalorder %s468_s11, %s464_s10  ;;  %p75_p2 = scmp.eq.s32.totalorder %s480_s14, 0 }
   0x7   : > { %s600_s15 = smov (%p37_p0, %s35_s15), 0  ;;  %p80_p4 = scmp.ne.s32.totalorder %s464_s10, %s460_s9 }
   0x8   : > { %p534_p3 = por %p75_p2, %p74_p1  ;;  %s60_s18 = ssub.s32 %s476_s13, %s600_s15 }
   0x9   : > { %p81_p5 = scmp.eq.s32.totalorder %s327_s0, 0  ;;  %p65_p6 = scmp.eq.s32.totalorder %s60_s18, 0 }
   0xa   : > { %p346_p8 = scmp.lt.s32.totalorder %s480_s14, 2  ;;  %s135_s21 = sand.u32 1, %s468_s11  }
   0xb   : > { %p541_p7 = por %p81_p5, %p80_p4  ;;  %s339_s22 = sshll.u32 %s476_s13, 3 }
   0xc   : > { %s547_s20 = scalar_select %p65_p6, %s468_s11, %s67_s16  }
   0xd   : > { %s331_s23 = sshll.u32 %s135_s21, 3  ;;  %s148_s26 = scalar_lea.hbm %s590_s1, %s339_s22 }
   0xe   : > { %s150_s27 = sshll.u32 %s148_s26, 4  ;;  %s139_s28 = scalar_lea.vmem [#allocation4], %s331_s23  ;;  %s151_s27 = int_to_ptr.hbm [resolvable:$true] %s150_s27 }
   0xf   : > { %s152_s29 = sshll.u32 %s139_s28, 4  ;;  %p343_p9 = pnand %p346_p8, %p534_p3  ;;  %s153_s29 = int_to_ptr.vmem [resolvable:$true] %s152_s29 }
  0x10   : > { %p334_p10 = scmp.ge.s32.totalorder %s480_s14, 1  ;;  %p157_p11 = scmp.lt.s32.totalorder %s480_s14, 3 }
  0x11   : > { %s136_s30 = scalar_lea.sflag [#allocation5], %s135_s21 }
  0x12   : > { %345 = dma.hbm_to_vmem [thread:$0]  (!%p343_p9), %s151_s27, 128, %s153_s29, %s136_s30  }
  0x13   : > { %p158_p12 = pnand %p334_p10, %p157_p11 }
  0x14   : > { %s163_s3 = sand.u32 (!%p158_p12), 1, %s464_s10  }
  0x15   : > { %161 = sbr.rel (%p158_p12) target bundleno = 194 (0xc2), region = 28  ;;  %s335_s4 = sshll.u32 (!%p158_p12), %s163_s3, 3 }
  0x16   : > { %s164_s5 = scalar_lea.sflag (!%p158_p12), [#allocation5], %s163_s3  ;;  %s167_s6 = scalar_lea.vmem (!%p158_p12), [#allocation4], %s335_s4 }
  0x1a   : > { %455 = dma.done.wait (%p541_p7), %s164_s5, 128  }
  0x1b   : > { %457 = vsyncadd (%p541_p7), %s164_s5, 4294967168  ;;  %vm203_vm0 = vcmask 3072   ;;  %v482_v0 = vmov 0.0   ;;  %v205_v1 = vld [vmem:[%s167_s6] sm:$0xff]  ;;  %vm216_vm1 = vcmask 1043456   ;;  %p192_p13 = scmp.lt.s32.totalorder %s472_s12, 1 }
  0x1c   : > { %204 = vst.msk [vmem:[#allocation2] sm:$0xf] %vm203_vm0, %v482_v0  ;;  %v206_v2 = vmax.f32 %v205_v1, 1e-06 }
  0x1d   : > { %s602_s12 = smov (!%p192_p13, %s472_s12), 1 }
  0x1e   : > { %v207_v3 = vmul.f32 %v206_v2, %v206_v2  ;;  %s336_s7 = sshll.u32 %s602_s12, 2 }
  0x1f   : > { %s198_s0 = scalar_lea.vmem %s591_s2, %s336_s7 }
  0x20   : > { %v208_v4 = vmul.f32 %v207_v3, %v206_v2 }
  0x22   : > { %211 = vst [vmem:[#allocation1] ss:$2 sm:$0xff] %v208_v4 }
  0x23   : > { %v209_v10 = vld [vmem:[#allocation2] sm:$0xf] }
  0x29   : > { %v212_v5 = vld.sshfl [vmem:[#allocation1] sm:$0xff pattern:$0x75316420]  ;;  %v213_v6 = vld.sshfl [vmem:[#allocation1 + $0x8] sm:$0xff pattern:$0x75316420] }
  0x2a   : > { %v217_v7 = vsel %vm216_vm1, %v212_v5, 0.0  ;;  %v218_v8 = vsel %vm216_vm1, %v213_v6, 0.0 }
  0x2b   : > { %v219_v9 = vadd.f32 %v218_v8, %v217_v7 }
  0x2d   : > { %220 = vadd.xlane.f32.xlu0 %v219_v9 }
  0xa0   : > { %v221_v11 = vpop.xlane.xlu0 %220 }
  0xa1   : > { %v222_v12 = vadd.f32 %v221_v11, %v209_v10 }
  0xa3   : > { %224 = vst.msk [vmem:[#allocation2] sm:$0xf] %vm203_vm0, %v222_v12 }
  0xaa   : > { %v228_v13 = vld [vmem:[#allocation2] sm:$0xf] }
  0xab   : > { %v229_v14 = vmul.f32 0.00390625, %v228_v13 }
  0xad   : > { %396 = vlog2.f32 %v229_v14 }
  0xb3   : > { %v397_v15 = vpop.eup %396 }
  0xb4   : > { %v231_v16 = vmul.f32 0.6931472, %v397_v15 }
  0xb6   : > { %v232_v17 = vmul.f32 0.33333334, %v231_v16 }
  0xb8   : > { %v233_v18 = vmul.f32 1.442695, %v232_v17 }
  0xba   : > { %398 = vpow2.f32 %v233_v18 }
  0xc0   : > { %v399_v19 = vpop.eup %398 }
  0xc1   : > { %235 = vst.msk [vmem:[%s198_s0] sm:$0xf] %vm203_vm0, %v399_v19 }
  0xc2 PF: > { %s16_s14 = sadd.s32 1, %s480_s14   ;;  %s594_s9 = smov %s464_s10 }
  0xc3   : > { %p13_p0 = scmp.ge.s32.totalorder %s16_s14, 4   ;;  %s595_s10 = smov %s468_s11 }
  0xc4   : > { %s596_s11 = smov %s547_s20  ;;  %s597_s12 = smov %s476_s13 }
  0xc5   : > { %s598_s13 = smov %s600_s15  ;;  %15 = sbr.rel (!%p13_p0) target bundleno = 4 (0x4), region = 76 }
  0xca   :  { %261 = vsyncpa [#allocation5], 1 }
  0xcb   :  { %263 = vsyncpa [#allocation5 + $0x1], 1 }

</bundles_post_ra>
